<compile_context>
chip_gen: v7x
topology: tpu7x:2x2x1
jax: 0.10.0
libtpu: 0.0.40
codegen_flags: <defaults>
</compile_context>

<pallas_src>
import functools

import numpy as np
import jax
import jax.numpy as jnp
from jax import lax
from jax.experimental import pallas as pl
from jax.experimental.pallas import tpu as pltpu

S_SCALE = 30.0  # LDAM "s" scale (default in the PyTorch module)


def _ldam_loss_kernel(x_ref, tgt_ref, wt_ref, sm_ref, out_ref, *, n_rows, s_scale):
    """One (TN, C) row tile -> partial (weighted-NLL numerator, weight-sum denominator)."""
    i = pl.program_id(0)

    x = x_ref[...].astype(jnp.float32)     # (TN, C) logits (bf16 inputs upcast here)
    tgt = tgt_ref[...]                     # (TN, 1) int32 labels
    w_t = wt_ref[...]                      # (TN, 1) f32 per-row class weight (wrapper gather)
    sm = sm_ref[...]                       # (1, C)  s * m_list (margin pre-scaled)

    tn, c = x.shape
    cls_idx = lax.broadcasted_iota(jnp.int32, (tn, c), 1)
    mask = cls_idx == tgt                  # bool one-hot (scatter_(1, target, 1)); no f32 convert

    # Margin folded into one masked subtract: only the true class is shifted.
    logits = s_scale * x - jnp.where(mask, sm, 0.0)            # (TN, C)

    # Row-wise LSE pieces; never materialize the full (TN, C) log-softmax.
    mx = jnp.max(logits, axis=-1, keepdims=True)               # (TN, 1)
    sumexp = jnp.sum(jnp.exp(logits - mx), axis=-1, keepdims=True)
    logit_t = jnp.sum(jnp.where(mask, logits, 0.0), axis=-1, keepdims=True)

    logp_t = logit_t - mx - jnp.log(sumexp)                    # log_softmax at target class

    # Mask padded rows of the last (partially filled) block out of both sums.
    # jnp.where is a select applied after the per-row math, so NaN/Inf from garbage
    # padded-row data cannot leak (a 0/1-mask multiply would give 0*Inf = NaN).
    row = i * tn + lax.broadcasted_iota(jnp.int32, (tn, 1), 0)
    valid = row < n_rows
    out_ref[0, 0] = jnp.sum(jnp.where(valid, -w_t * logp_t, 0.0))   # partial numerator
    out_ref[0, 1] = jnp.sum(jnp.where(valid, w_t, 0.0))             # partial denominator


def _vmem_capacity_bytes():
    """Physical VMEM per TensorCore (128 MiB on v5e/v6e, 64 MiB on v7x); conservative fallback."""
    try:
        return int(pltpu.get_tpu_info().vmem_capacity_bytes)
    except Exception:
        return 64 * 1024 * 1024


def _tile_budget_and_vmem_limit(vmem_cap_bytes):
    """(per-tile x budget, vmem_limit_bytes) — chip-aware."""
    if vmem_cap_bytes >= 96 * 1024 * 1024:
        # v5e / v6e: 128 MiB physical VMEM -> bigger tiles, fewer grid steps, longer DMAs.
        return 12 * 1024 * 1024, 64 * 1024 * 1024
    # v7x (64 MiB physical, 32 MiB scoped default) or unknown: stay at ~4 MiB tiles.
    return 4 * 1024 * 1024, 32 * 1024 * 1024


def _choose_tile_rows(n, c, itemsize, budget_bytes):
    """Size the x tile purely by the VMEM byte budget (no row cap); rows % 8 (f32) / % 16 (bf16)."""
    mult = 16 if itemsize < 4 else 8
    rows = budget_bytes // max(1, c * itemsize)
    rows = max(mult, (rows // mult) * mult)
    return n if n <= rows else rows


def ldam_loss(x, target, m_list, per_cls_weights=None, *, s=S_SCALE, tile_rows=None):
    """x: (N, C) f32/bf16; target: (N,) int; m_list: (C,) f32; per_cls_weights: (C,) f32 or None."""
    n, c = x.shape
    tgt = target.reshape(n, 1).astype(jnp.int32)
    sm = (float(s) * m_list.astype(jnp.float32)).reshape(1, c)

    # Per-row class weight gathered once in the wrapper (removes a (TN,C) multiply + one
    # cross-lane reduction from the kernel for only 4N extra HBM bytes).
    if per_cls_weights is None:
        w_t = jnp.ones((n, 1), jnp.float32)                    # F.cross_entropy(weight=None)
    else:
        w_t = per_cls_weights.astype(jnp.float32)[target].reshape(n, 1)

    budget_bytes, vmem_limit = _tile_budget_and_vmem_limit(_vmem_capacity_bytes())
    if tile_rows is None:
        tn = _choose_tile_rows(n, c, x.dtype.itemsize, budget_bytes)
    else:
        tn = int(tile_rows)
    g = pl.cdiv(n, tn)

    kernel = functools.partial(_ldam_loss_kernel, n_rows=n, s_scale=float(s))

    cost = pl.CostEstimate(
        flops=6 * n * c,
        transcendentals=n * c + n,
        bytes_accessed=n * c * x.dtype.itemsize + 8 * n + 4 * c + 8 * g,
    )

    partials = pl.pallas_call(
        kernel,
        out_shape=jax.ShapeDtypeStruct((g, 2), jnp.float32),
        grid=(g,),
        in_specs=[
            pl.BlockSpec((tn, c), lambda i: (i, 0)),   # x row tile (pipelined)
            pl.BlockSpec((tn, 1), lambda i: (i, 0)),   # target row tile
            pl.BlockSpec((tn, 1), lambda i: (i, 0)),   # per-row class weight tile
            pl.BlockSpec((1, c), lambda i: (0, 0)),    # s * m_list (block-resident)
        ],
        out_specs=pl.BlockSpec((1, 2), lambda i: (i, 0),
                               memory_space=pltpu.MemorySpace.SMEM),  # (num, den) partials
        compiler_params=pltpu.CompilerParams(
            # "parallel" lets v7x shard row tiles across its 2 TCs; on v5e/v6e it is a
            # no-op. (If an xprof trace shows only one v7x TC busy, switch to
            # pltpu.CORE_PARALLEL with an explicit leading core axis.)
            dimension_semantics=("parallel",),
            vmem_limit_bytes=vmem_limit,
        ),
        cost_estimate=cost,
    )(x, tgt, w_t, sm)

    # Final scalar reduction of per-block partials (tiny, done in plain JAX).
    num_den = jnp.sum(partials, axis=0)
    return (num_den[0] / num_den[1]).astype(jnp.float32)


def make_params(cls_num_list, max_m=0.5, beta=0.9999):
    """Deterministic parameter setup mirroring LDAMLoss.__init__ (+ a non-trivial weight)."""
    ncl = np.asarray(cls_num_list, dtype=np.float64)
    m_list = 1.0 / np.sqrt(np.sqrt(ncl))
    m_list = m_list * (max_m / np.max(m_list))
    # Class-balanced weights as an example of the optional `weight=` argument.
    effective_num = 1.0 - np.power(beta, ncl)
    per_cls_weights = (1.0 - beta) / effective_num
    per_cls_weights = per_cls_weights / np.sum(per_cls_weights) * len(ncl)
    return (jnp.asarray(m_list, dtype=jnp.float32),
            jnp.asarray(per_cls_weights, dtype=jnp.float32))


def _reference(x, target, m_list, w):
    """Pure-JAX f32 reference (mirrors the PyTorch forward) for sanity checking."""
    n, c = x.shape
    onehot = jax.nn.one_hot(target, c, dtype=jnp.float32)
    batch_m = (onehot * m_list[None, :]).sum(-1, keepdims=True)
    out = jnp.where(onehot > 0, x - batch_m, x)
    logits = S_SCALE * out
    logp = jax.nn.log_softmax(logits, axis=-1)
    logp_t = (onehot * logp).sum(-1)
    w_t = w[target] if w is not None else jnp.ones((n,), jnp.float32)
    return jnp.sum(-w_t * logp_t) / jnp.sum(w_t)


if __name__ == "__main__":
    # Small, deterministic setup.
    num_class_list = [100, 60, 30, 20, 10, 8, 5, 2]   # C = 8 classes
    C = len(num_class_list)
    N = 12                                            # batch (not a multiple of the forced tile)

    m_list, per_cls_weights = make_params(num_class_list)

    key = jax.random.PRNGKey(0)
    kx, kt = jax.random.split(key)
    x = jax.random.normal(kx, (N, C), dtype=jnp.float32)
    target = jax.random.randint(kt, (N,), 0, C, dtype=jnp.int32)

    ref = jax.block_until_ready(_reference(x, target, m_list, per_cls_weights))

    # 1) Default tiling: whole batch fits in one block (f32).
    loss_a = jax.block_until_ready(ldam_loss(x, target, m_list, per_cls_weights))
    # 2) Forced small tile: 2 grid steps, last block partially filled (exercises row masking).
    loss_b = jax.block_until_ready(
        ldam_loss(x, target, m_list, per_cls_weights, tile_rows=8))
    # 3) bf16 input over HBM (bandwidth path); compare against a bf16-quantized f32 reference
    #    so the check isolates kernel correctness from input quantization error.
    x_bf16 = x.astype(jnp.bfloat16)
    ref_bf16 = jax.block_until_ready(
        _reference(x_bf16.astype(jnp.float32), target, m_list, per_cls_weights))
    loss_c = jax.block_until_ready(ldam_loss(x_bf16, target, m_list, per_cls_weights))

    assert np.allclose(np.asarray(loss_a), np.asarray(ref), rtol=1e-5, atol=1e-5), (loss_a, ref)
    assert np.allclose(np.asarray(loss_b), np.asarray(ref), rtol=1e-5, atol=1e-5), (loss_b, ref)
    assert np.allclose(np.asarray(loss_c), np.asarray(ref_bf16), rtol=1e-5, atol=1e-5), (loss_c, ref_bf16)
    print("KERNEL_OK")
</pallas_src>

<mosaic_0001>
module attributes {stable_mosaic.version = 11 : i64} {
  func.func @_ldam_loss_kernel(%arg0: i32, %arg1: memref<12x8xf32, #tpu.memory_space<vmem>>, %arg2: memref<12x1xi32, #tpu.memory_space<vmem>>, %arg3: memref<12x1xf32, #tpu.memory_space<vmem>>, %arg4: memref<1x8xf32, #tpu.memory_space<vmem>>, %arg5: memref<1x2xf32, #tpu.memory_space<smem>>) attributes {dimension_semantics = [#tpu.dimension_semantics<parallel>], iteration_bounds = array<i64: 1>, scalar_prefetch = 0 : i64, scratch_operands = 0 : i64, tpu.core_type = #tpu.core_type<tc>, window_params = [{transform_indices = @transform_0, window_bounds = array<i64: 12, 8>}, {transform_indices = @transform_1, window_bounds = array<i64: 12, 1>}, {transform_indices = @transform_2, window_bounds = array<i64: 12, 1>}, {pipeline_mode = #tpu.pipeline_mode<synchronous>, transform_indices = @transform_3, window_bounds = array<i64: 1, 8>}, {transform_indices = @transform_4, window_bounds = array<i64: 1, 2>}]} {
    %c0 = arith.constant 0 : index
    %c0_0 = arith.constant 0 : index
    %0 = vector.load %arg1[%c0, %c0_0] : memref<12x8xf32, #tpu.memory_space<vmem>>, vector<12x8xf32>
    %c0_1 = arith.constant 0 : index
    %c0_2 = arith.constant 0 : index
    %1 = vector.load %arg2[%c0_1, %c0_2] : memref<12x1xi32, #tpu.memory_space<vmem>>, vector<12x1xi32>
    %c0_3 = arith.constant 0 : index
    %c0_4 = arith.constant 0 : index
    %2 = vector.load %arg3[%c0_3, %c0_4] : memref<12x1xf32, #tpu.memory_space<vmem>>, vector<12x1xf32>
    %c0_5 = arith.constant 0 : index
    %c0_6 = arith.constant 0 : index
    %3 = vector.load %arg4[%c0_5, %c0_6] : memref<1x8xf32, #tpu.memory_space<vmem>>, vector<1x8xf32>
    %4 = tpu.iota {dimensions = array<i32: 1>} : vector<12x8xi32>
    %5 = vector.broadcast %1 : vector<12x1xi32> to vector<12x8xi32>
    %6 = arith.cmpi eq, %4, %5 : vector<12x8xi32>
    %cst = arith.constant 3.000000e+01 : f32
    %7 = vector.broadcast %cst : f32 to vector<12x8xf32>
    %8 = arith.mulf %7, %0 : vector<12x8xf32>
    %cst_7 = arith.constant 0.000000e+00 : f32
    %9 = vector.shape_cast %3 : vector<1x8xf32> to vector<1x8xf32>
    %10 = vector.broadcast %9 : vector<1x8xf32> to vector<12x8xf32>
    %11 = vector.broadcast %cst_7 : f32 to vector<12x8xf32>
    %12 = arith.select %6, %10, %11 : vector<12x8xi1>, vector<12x8xf32>
    %13 = arith.subf %8, %12 : vector<12x8xf32>
    %cst_8 = arith.constant dense<0xFF800000> : vector<12xf32>
    %14 = vector.multi_reduction <maximumf>, %13, %cst_8 [1] : vector<12x8xf32> to vector<12xf32>
    %15 = vector.shape_cast %14 : vector<12xf32> to vector<12x1xf32>
    %16 = vector.broadcast %15 : vector<12x1xf32> to vector<12x8xf32>
    %17 = arith.subf %13, %16 : vector<12x8xf32>
    %18 = math.exp %17 : vector<12x8xf32>
    %cst_9 = arith.constant dense<0.000000e+00> : vector<12xf32>
    %19 = vector.multi_reduction <add>, %18, %cst_9 [1] : vector<12x8xf32> to vector<12xf32>
    %20 = vector.shape_cast %19 : vector<12xf32> to vector<12x1xf32>
    %cst_10 = arith.constant 0.000000e+00 : f32
    %21 = vector.broadcast %cst_10 : f32 to vector<12x8xf32>
    %22 = arith.select %6, %13, %21 : vector<12x8xi1>, vector<12x8xf32>
    %cst_11 = arith.constant dense<0.000000e+00> : vector<12xf32>
    %23 = vector.multi_reduction <add>, %22, %cst_11 [1] : vector<12x8xf32> to vector<12xf32>
    %24 = vector.shape_cast %23 : vector<12xf32> to vector<12x1xf32>
    %25 = arith.subf %24, %15 : vector<12x1xf32>
    %26 = math.log %20 : vector<12x1xf32>
    %27 = arith.subf %25, %26 : vector<12x1xf32>
    %c12_i32 = arith.constant 12 : i32
    %28 = arith.muli %arg0, %c12_i32 : i32
    %29 = tpu.iota {dimensions = array<i32: 0>} : vector<12x1xi32>
    %30 = vector.broadcast %28 : i32 to vector<12x1xi32>
    %31 = arith.addi %30, %29 : vector<12x1xi32>
    %c12_i32_12 = arith.constant 12 : i32
    %32 = vector.broadcast %c12_i32_12 : i32 to vector<12x1xi32>
    %33 = arith.cmpi slt, %31, %32 : vector<12x1xi32>
    %cst_13 = arith.constant 0.000000e+00 : f32
    %34 = vector.broadcast %cst_13 : f32 to vector<12x1xf32>
    %35 = arith.subf %34, %2 : vector<12x1xf32>
    %36 = arith.mulf %35, %27 : vector<12x1xf32>
    %cst_14 = arith.constant 0.000000e+00 : f32
    %37 = vector.broadcast %cst_14 : f32 to vector<12x1xf32>
    %38 = arith.select %33, %36, %37 : vector<12x1xi1>, vector<12x1xf32>
    %39 = vector.shape_cast %38 : vector<12x1xf32> to vector<1x12x1xf32>
    %cst_15 = arith.constant dense<0.000000e+00> : vector<1xf32>
    %40 = vector.multi_reduction <add>, %39, %cst_15 [1, 2] : vector<1x12x1xf32> to vector<1xf32>
    %41 = vector.shape_cast %40 : vector<1xf32> to vector<1x1x1xf32>
    %42 = vector.extract %41[0, 0, 0] : f32 from vector<1x1x1xf32>
    %c0_16 = arith.constant 0 : index
    %c0_17 = arith.constant 0 : index
    %43 = memref.load %arg5[%c0_16, %c0_17] : memref<1x2xf32, #tpu.memory_space<smem>>
    memref.store %42, %arg5[%c0_16, %c0_17] : memref<1x2xf32, #tpu.memory_space<smem>>
    %cst_18 = arith.constant 0.000000e+00 : f32
    %44 = vector.broadcast %cst_18 : f32 to vector<12x1xf32>
    %45 = arith.select %33, %2, %44 : vector<12x1xi1>, vector<12x1xf32>
    %46 = vector.shape_cast %45 : vector<12x1xf32> to vector<1x12x1xf32>
    %cst_19 = arith.constant dense<0.000000e+00> : vector<1xf32>
    %47 = vector.multi_reduction <add>, %46, %cst_19 [1, 2] : vector<1x12x1xf32> to vector<1xf32>
    %48 = vector.shape_cast %47 : vector<1xf32> to vector<1x1x1xf32>
    %49 = vector.extract %48[0, 0, 0] : f32 from vector<1x1x1xf32>
    %c0_20 = arith.constant 0 : index
    %c1 = arith.constant 1 : index
    %50 = memref.load %arg5[%c0_20, %c1] : memref<1x2xf32, #tpu.memory_space<smem>>
    memref.store %49, %arg5[%c0_20, %c1] : memref<1x2xf32, #tpu.memory_space<smem>>
    return
  }
  func.func @transform_0(%arg0: i32) -> (i32, i32) {
    %c0_i32 = arith.constant 0 : i32
    %c0_i32_0 = arith.constant 0 : i32
    return %arg0, %c0_i32 : i32, i32
  }
  func.func @transform_1(%arg0: i32) -> (i32, i32) {
    %c0_i32 = arith.constant 0 : i32
    %c0_i32_0 = arith.constant 0 : i32
    return %arg0, %c0_i32 : i32, i32
  }
  func.func @transform_2(%arg0: i32) -> (i32, i32) {
    %c0_i32 = arith.constant 0 : i32
    %c0_i32_0 = arith.constant 0 : i32
    return %arg0, %c0_i32 : i32, i32
  }
  func.func @transform_3(%arg0: i32) -> (i32, i32) {
    %c0_i32 = arith.constant 0 : i32
    %c0_i32_0 = arith.constant 0 : i32
    %c0_i32_1 = arith.constant 0 : i32
    return %c0_i32, %c0_i32_0 : i32, i32
  }
  func.func @transform_4(%arg0: i32) -> (i32, i32) {
    %c0_i32 = arith.constant 0 : i32
    %c0_i32_0 = arith.constant 0 : i32
    return %arg0, %c0_i32 : i32, i32
  }
}

</mosaic_0001>

<bundles_post_ra>
// kernel: tpu_custom_call.1
= control target key start
LH: loop header
LB: loop body
LE: loop exit
PB: predicated region body
PF: predicated region fallthrough
CT: control target
= control target key end

     0   :  { %v171_v1 = vmov 0   ;;  %s241_s0 = inlined_call_operand.vmem [shape: f32[12,8], index: 0, kind: input, shape index: {}]   ;;  %s242_s1 = inlined_call_operand.vmem [shape: s32[12,1], index: 1, kind: input, shape index: {}]   ;;  %s243_s2 = inlined_call_operand.vmem [shape: f32[12,1], index: 2, kind: input, shape index: {}]   ;;  %s244_s3 = inlined_call_operand.vmem [shape: f32[1,8], index: 3, kind: input, shape index: {}]   ;;  %s245_s4 = inlined_call_operand.hbm [shape: f32[1,2], index: 4, kind: output, shape index: {}]  }
   0x1   :  { %v21_v0 = vld [vmem:[%s242_s1 + $0x8] sm:$0xf]  ;;  %150 = vset.pattern.permute.xlu0 %v171_v1 }
   0x2   :  { %9 = vsyncpa [#allocation3], 0  ;;  %31 = vperm.xlu0 %150, %v21_v0   ;;  %v20_v2 = vld [vmem:[%s242_s1] sm:$0xff]  ;;  %v25_v3 = vlaneseq  ;;  %v19_v4 = vld [vmem:[%s241_s0 + $0x8] sm:$0xf]  ;;  %vm51_vm1 = vcmask 60416  }
   0x3   :  { %v143_v6 = vld [vmem:[%s244_s3] ss:$0 sm:$0xff]  ;;  %v36_v7 = vmul.f32 30.0, %v19_v4  ;;  %vm47_vm3 = vcmask 64512   ;;  %v23_v36 = vld [vmem:[%s243_s2 + $0x8] sm:$0xf] }
   0x4   :  { %v26_v5 = vand.u32 127, %v25_v3  ;;  %v18_v9 = vld [vmem:[%s241_s0] sm:$0xff]  ;;  %v85_v34 = vshrl.u32 %v25_v3, 7  ;;  %v93_v40 = vsub.f32 0.0, %v23_v36  ;;  %vm98_vm5 = vcmask 7168   ;;  %s159_s29 = scalar_lea.hbm %s245_s4, 16 }
   0x5   :  { %v35_v12 = vmul.f32 30.0, %v18_v9  ;;  %v22_v43 = vld [vmem:[%s243_s2] sm:$0xff]  ;;  %vm100_vm6 = vcmask 3072   ;;  %p160_p0 = scmp.ne.s32.totalorder %s245_s4, %s159_s29  ;;  %p163_p1 = scmp.lt.u32.totalorder %s159_s29, %s245_s4 }
   0x6   :  { %28 = vperm.xlu0 %150, %v20_v2   ;;  %v86_v38 = vadd.s32 8, %v85_v34  ;;  %v92_v49 = vsub.f32 0.0, %v22_v43  ;;  %v116_v56 = vsel %vm98_vm5, %v22_v43, 0.0 }
   0x7   :  { %p165_p2 = pnand %p163_p1, %p160_p0 }
   0x8   :  { %vm91_vm4 = vcmp.lt.s32.totalorder %v86_v38, 12 }
   0x9   :  { %v115_v52 = vsel %vm91_vm4, %v23_v36, 0.0 }
   0xa   :  { %v117_v57 = vsel %vm100_vm6, %v115_v52, 0.0 }
   0xb   :  { %v118_v59 = vadd.f32 %v117_v57, %v116_v56 }
  0x81   :  { %v32_v8 = vpop.permute.xlu0 %31 }
  0x82   :  { %vm34_vm0 = vcmp.eq.s32.totalorder %v26_v5, %v32_v8 }
  0x83   :  { %v44_v10 = vsel %vm34_vm0, %v143_v6, 0.0 }
  0x84   :  { %v46_v11 = vsub.f32 %v36_v7, %v44_v10 }
  0x85   :  { %v29_v13 = vpop.permute.xlu0 %28 }
  0x86   :  { %vm33_vm2 = vcmp.eq.s32.totalorder %v26_v5, %v29_v13  ;;  %v52_v14 = vsel %vm51_vm1, %v46_v11, -inf  ;;  %v68_v28 = vsel %vm34_vm0, %v46_v11, 0.0 }
  0x87   :  { %v43_v15 = vsel %vm33_vm2, %v143_v6, 0.0  ;;  %53 = vmax.xlane.f32.xlu1 %v52_v14  ;;  %v72_v29 = vsel %vm51_vm1, %v68_v28, 0.0 }
  0x88   :  { %v45_v16 = vsub.f32 %v35_v12, %v43_v15 }
  0x8a   :  { %v48_v17 = vsel %vm47_vm3, %v45_v16, -inf  ;;  %v67_v30 = vsel %vm33_vm2, %v45_v16, 0.0 }
  0x8b   :  { %49 = vmax.xlane.f32.xlu1 %v48_v17  ;;  %v69_v31 = vsel %vm47_vm3, %v67_v30, 0.0 }
 0x114   :  { %v54_v18 = vpop.xlane.xlu1 %53 }
 0x115   :  { %v56_v19 = vsub.f32 %v46_v11, %v54_v18 }
 0x117   :  { %v59_v20 = vmul.f32 1.442695, %v56_v19 }
 0x118   :  { %v50_v21 = vpop.xlane.xlu1 %49 }
 0x119   :  { %151 = vpow2.f32 %v59_v20  ;;  %v55_v22 = vsub.f32 %v45_v16, %v50_v21 }
 0x11b   :  { %v57_v23 = vmul.f32 1.442695, %v55_v22 }
 0x11d   :  { %153 = vpow2.f32 %v57_v23 }
 0x123   :  { %v152_v24 = vpop.eup %151 }
 0x124   :  { %v64_v25 = vsel %vm51_vm1, %v152_v24, 0.0 }
 0x125   :  { %65 = vadd.xlane.f32.xlu0 %v64_v25 }
 0x127   :  { %v154_v26 = vpop.eup %153 }
 0x128   :  { %v61_v27 = vsel %vm47_vm3, %v154_v26, 0.0 }
 0x129   :  { %62 = vadd.xlane.f32.xlu1 %v61_v27 }
 0x12d   :  { %73 = vadd.xlane.f32.xlu1 %v72_v29 }
 0x131   :  { %70 = vadd.xlane.f32.xlu1 %v69_v31 }
 0x1b2   :  { %v66_v32 = vpop.xlane.xlu0 %65 }
 0x1b3   :  { %155 = vlog2.f32 %v66_v32 }
 0x1b6   :  { %v63_v33 = vpop.xlane.xlu1 %62 }
 0x1b7   :  { %157 = vlog2.f32 %v63_v33 }
 0x1ba   :  { %v74_v35 = vpop.xlane.xlu1 %73 }
 0x1bb   :  { %v76_v41 = vsub.f32 %v74_v35, %v54_v18 }
 0x1bd   :  { %v156_v37 = vpop.eup %155 }
 0x1be   :  { %v80_v39 = vmul.f32 0.6931472, %v156_v37  ;;  %v71_v42 = vpop.xlane.xlu1 %70 }
 0x1bf   :  { %v75_v48 = vsub.f32 %v71_v42, %v50_v21 }
 0x1c0   :  { %v82_v44 = vsub.f32 %v76_v41, %v80_v39 }
 0x1c1   :  { %v158_v45 = vpop.eup %157 }
 0x1c2   :  { %v78_v46 = vmul.f32 0.6931472, %v158_v45  ;;  %v95_v47 = vmul.f32 %v93_v40, %v82_v44 }
 0x1c4   :  { %v81_v50 = vsub.f32 %v75_v48, %v78_v46  ;;  %v97_v51 = vsel %vm91_vm4, %v95_v47, 0.0 }
 0x1c5   :  { %v101_v55 = vsel %vm100_vm6, %v97_v51, 0.0 }
 0x1c6   :  { %v94_v53 = vmul.f32 %v92_v49, %v81_v50 }
 0x1c8   :  { %v99_v54 = vsel %vm98_vm5, %v94_v53, 0.0 }
 0x1c9   :  { %v102_v58 = vadd.f32 %v101_v55, %v99_v54 }
 0x1cb   :  { %103 = vadd.xlane.f32.xlu1 %v102_v58 }
 0x1cf   :  { %119 = vadd.xlane.f32.xlu1 %v118_v59 }
 0x258   :  { %v104_v60 = vpop.xlane.xlu1 %103 }
 0x259   :  { %v105_v61 = vrot.slane %v104_v60, 4 }
 0x25b   :  { %v106_v62 = vadd.f32 %v105_v61, %v104_v60 }
 0x25c   :  { %v120_v63 = vpop.xlane.xlu1 %119 }
 0x25d   :  { %v107_v0 = vrot.slane %v106_v62, 2  ;;  %v121_v1 = vrot.slane %v120_v63, 4 }
 0x25f   :  { %v122_v2 = vadd.f32 %v121_v1, %v120_v63  ;;  %v108_v3 = vadd.f32 %v107_v0, %v106_v62 }
 0x261   :  { %v123_v4 = vrot.slane %v122_v2, 2  ;;  %v109_v5 = vrot.slane %v108_v3, 1 }
 0x263   :  { %v124_v6 = vadd.f32 %v123_v4, %v122_v2  ;;  %v110_v7 = vadd.f32 %v109_v5, %v108_v3 }
 0x265   :  { %144 = vpush %v110_v7  ;;  %v125_v8 = vrot.slane %v124_v6, 1 }
 0x267   :  { %v126_v9 = vadd.f32 %v125_v8, %v124_v6 }
 0x269   :  { %146 = vpush %v126_v9 }
 0x296   :  { %s145_s2 = spop %144 }
 0x297   :  { %113 = sst [smem:[#allocation2]] %s145_s2 }
 0x29a   :  { %s147_s26 = spop %146 }
 0x29b   :  { %129 = sst [smem:[#allocation2 + $0x1]] %s147_s26 }
 0x29c   :  { %168 = shalt.err (!%p165_p2)
}
 0x29d   :  { %s172_s8 = smov [#allocation2]  }
 0x29e   :  { %137 = dma.smem_to_hbm %s172_s8, 16, %s245_s4, [#allocation3]  }
 0x29f   :  { %169 = dma.done.wait [#allocation3], 16  }
 0x2a0   :  { %170 = vsyncadd [#allocation3], 4294967280 }
 0x2a1   :  { %141 = sfence }
 0x2a2   :  { %142 = vsyncpa [#allocation3], 1 }

</bundles_post_ra>
